<compile_context>
chip_gen: v7x
topology: tpu7x:2x2x1
jax: 0.10.0
libtpu: 0.0.40
codegen_flags: <defaults>
</compile_context>

<pallas_src>
import functools

import jax
import jax.numpy as jnp
from jax import lax
from jax.experimental import pallas as pl
from jax.experimental.pallas import tpu as pltpu

LANE = 128
SUBLANE = 8


def _round_up(n, m):
    return (n + m - 1) // m * m


def _vmem_limit_bytes():
    # ~75% of physical VMEM per generation (96 MiB on v5e/v6e, 48 MiB per
    # TensorCore on v7x).  Fall back to a conservative constant.
    try:
        return int(pltpu.get_tpu_info().vmem_capacity_bytes * 3 // 4)
    except Exception:
        return 48 * 1024 * 1024


def _row_tile(s8):
    # v6e/v7x MXUs are 256 wide -> 256-row tiles; v5e is 128 wide.
    tile = 256
    try:
        if "v5" in jax.devices()[0].device_kind.lower():
            tile = 128
    except Exception:
        pass
    return min(tile, s8)


# ---------------- kernel 1: fused K/V projection -----------------------------
def _kv_proj_kernel(x_ref, w_ref, b_ref, kv_ref):
    # (T, Dp)bf16 @ (Dp, 2*Hp)bf16 -> f32 accumulate, + f32 bias, store bf16.
    acc = jnp.dot(x_ref[...].astype(jnp.bfloat16), w_ref[...],
                  preferred_element_type=jnp.float32) + b_ref[...]
    kv_ref[...] = acc.astype(jnp.bfloat16)


# ---------------- kernel 2: Q proj + flash attention + residual --------------
def _attn_kernel(x_ref, wq_ref, bq_ref, k_ref, v_ref, o_ref,
                 q_s, m_s, l_s, acc_s, *, s_valid, tk):
    kv = pl.program_id(1)

    @pl.when(kv == 0)
    def _():
        # Q projection for this query-row tile (bf16 MXU operands, f32 acc),
        # reusing the x tile that the residual add needs anyway.
        q = jnp.dot(x_ref[...].astype(jnp.bfloat16), wq_ref[...],
                    preferred_element_type=jnp.float32) + bq_ref[...]
        q_s[...] = q.astype(jnp.bfloat16)
        m_s[...] = jnp.full_like(m_s, -jnp.inf)
        l_s[...] = jnp.zeros_like(l_s)
        acc_s[...] = jnp.zeros_like(acc_s)

    # Scores: Q @ K^T as a contraction over the hidden dim (no XLU transpose),
    # bf16 operands, f32 accumulation.
    s = lax.dot_general(q_s[...], k_ref[...], (((1,), (1,)), ((), ())),
                        preferred_element_type=jnp.float32)          # (T, TK)

    if s_valid is not None:
        # Mask padded key columns (only emitted when padding was added).
        col = kv * tk + lax.broadcasted_iota(jnp.int32, s.shape, 1)
        s = jnp.where(col < s_valid, s, -jnp.inf)

    # Online softmax -- all f32 (also the safe path on v5e).
    m_new = jnp.maximum(m_s[...], jnp.max(s, axis=-1, keepdims=True))
    alpha = jnp.exp(m_s[...] - m_new)
    p = jnp.exp(s - m_new)
    l_s[...] = alpha * l_s[...] + jnp.sum(p, axis=-1, keepdims=True)
    acc_s[...] = alpha * acc_s[...] + jnp.dot(
        p.astype(jnp.bfloat16), v_ref[...], preferred_element_type=jnp.float32)
    m_s[...] = m_new

    @pl.when(kv == pl.num_programs(1) - 1)
    def _():
        # Exact divide for the final normalization (parity with the reference)
        # and the residual add, both in f32.
        o_ref[...] = acc_s[...] / l_s[...] + x_ref[...]


def bidirectional_attention_classifier(x, wq, bq, wk, bk, wv, bv):
    """x: (S, D) f32.  wq/wk/wv: (H, D) PyTorch-layout Linear weights,
    bq/bk/bv: (H,).  Requires H == D (the module's residual add implies it)."""
    S, D = x.shape
    H = wq.shape[0]
    assert H == D, "hidden_size must equal input_size for the residual add"

    # ---- padded, lane-dense layout ------------------------------------------
    Dp = _round_up(D, LANE)
    Hp = Dp                                  # H == D
    S8 = _round_up(S, SUBLANE)
    T = _row_tile(S8)                        # query-row tile == K/V-row tile
    Sp = _round_up(S8, T)
    n_tiles = Sp // T
    vmem_limit = _vmem_limit_bytes()

    x_p = jnp.zeros((Sp, Dp), jnp.float32).at[:S, :D].set(x.astype(jnp.float32))

    def pad_wt(w):   # (H, D) PyTorch weight -> padded (Dp, Hp) of W^T in bf16
        return jnp.zeros((Dp, Hp), jnp.bfloat16).at[:D, :H].set(
            w.T.astype(jnp.bfloat16))

    def pad_b(b):    # (H,) -> padded (1, Hp) f32 (bias added after f32 acc)
        return jnp.zeros((1, Hp), jnp.float32).at[0, :H].set(
            b.astype(jnp.float32))

    # Fused K/V weight (Dp, 2*Hp) bf16 and bias (1, 2*Hp) f32; separate Q.
    w_kv = jnp.concatenate([pad_wt(wk), pad_wt(wv)], axis=1)
    b_kv = jnp.concatenate([pad_b(bk), pad_b(bv)], axis=1)
    w_q = pad_wt(wq)
    b_q = pad_b(bq)

    # ---- kernel 1: fused K/V projection, tiled over rows ---------------------
    kv = pl.pallas_call(
        _kv_proj_kernel,
        out_shape=jax.ShapeDtypeStruct((Sp, 2 * Hp), jnp.bfloat16),
        grid=(n_tiles,),
        in_specs=[
            pl.BlockSpec((T, Dp), lambda i: (i, 0)),                  # x rows
            pl.BlockSpec((Dp, 2 * Hp), lambda i: (0, 0),
                         pipeline_mode=pl.Buffered(1)),               # W^T const
            pl.BlockSpec((1, 2 * Hp), lambda i: (0, 0),
                         pipeline_mode=pl.Buffered(1)),               # bias const
        ],
        out_specs=pl.BlockSpec((T, 2 * Hp), lambda i: (i, 0)),
        compiler_params=pltpu.CompilerParams(
            dimension_semantics=("parallel",),
            vmem_limit_bytes=vmem_limit),
        cost_estimate=pl.CostEstimate(
            flops=2 * Sp * Dp * 2 * Hp,
            transcendentals=0,
            bytes_accessed=(4 * Sp * Dp + 2 * Dp * 2 * Hp
                            + 4 * 2 * Hp + 2 * Sp * 2 * Hp)),
    )(x_p, w_kv, b_kv)

    # ---- kernel 2: Q proj + flash attention + residual -----------------------
    attn = functools.partial(_attn_kernel,
                             s_valid=(S if Sp > S else None), tk=T)
    out_p = pl.pallas_call(
        attn,
        out_shape=jax.ShapeDtypeStruct((Sp, Dp), jnp.float32),
        grid=(n_tiles, n_tiles),                 # (query tiles, K/V tiles)
        in_specs=[
            pl.BlockSpec((T, Dp), lambda i, k: (i, 0)),               # x tile
            pl.BlockSpec((Dp, Hp), lambda i, k: (0, 0),
                         pipeline_mode=pl.Buffered(1)),               # Wq^T const
            pl.BlockSpec((1, Hp), lambda i, k: (0, 0),
                         pipeline_mode=pl.Buffered(1)),               # bq const
            pl.BlockSpec((T, Hp), lambda i, k: (k, 0)),               # K tile
            pl.BlockSpec((T, Hp), lambda i, k: (k, 1)),               # V tile
        ],
        out_specs=pl.BlockSpec((T, Dp), lambda i, k: (i, 0)),
        scratch_shapes=[
            pltpu.VMEM((T, Hp), jnp.bfloat16),   # q tile
            pltpu.VMEM((T, 1), jnp.float32),     # running max
            pltpu.VMEM((T, 1), jnp.float32),     # running sum
            pltpu.VMEM((T, Hp), jnp.float32),    # output accumulator
        ],
        compiler_params=pltpu.CompilerParams(
            dimension_semantics=("parallel", "arbitrary"),
            vmem_limit_bytes=vmem_limit),
        cost_estimate=pl.CostEstimate(
            flops=2 * Sp * Dp * Hp + 4 * Sp * Sp * Hp,
            transcendentals=Sp * Sp,
            bytes_accessed=(4 * Sp * Dp + 2 * Dp * Hp
                            + 2 * n_tiles * Sp * 2 * Hp + 4 * Sp * Dp)),
    )(x_p, w_q, b_q, kv, kv)

    return out_p[:S, :D]


def _reference(x, wq, bq, wk, bk, wv, bv):
    q = x @ wq.T + bq
    k = x @ wk.T + bk
    v = x @ wv.T + bv
    p = jax.nn.softmax(q @ k.T, axis=-1)
    return p @ v + x


if __name__ == "__main__":
    S = 8          # sequence length
    D = 32         # input_size == hidden_size
    H = 32

    key = jax.random.PRNGKey(0)
    kx, kwq, kbq, kwk, kbk, kwv, kbv = jax.random.split(key, 7)

    bound = 1.0 / jnp.sqrt(D)
    x = jax.random.normal(kx, (S, D), dtype=jnp.float32)
    wq = jax.random.uniform(kwq, (H, D), jnp.float32, -bound, bound)
    bq = jax.random.uniform(kbq, (H,), jnp.float32, -bound, bound)
    wk = jax.random.uniform(kwk, (H, D), jnp.float32, -bound, bound)
    bk = jax.random.uniform(kbk, (H,), jnp.float32, -bound, bound)
    wv = jax.random.uniform(kwv, (H, D), jnp.float32, -bound, bound)
    bv = jax.random.uniform(kbv, (H,), jnp.float32, -bound, bound)

    out = bidirectional_attention_classifier(x, wq, bq, wk, bk, wv, bv)
    out = jax.block_until_ready(out)

    ref = _reference(x, wq, bq, wk, bk, wv, bv)
    assert out.shape == (S, D)
    # Tolerance accounts for bf16 MXU operands (f32 accumulation / f32 softmax).
    assert jnp.allclose(out, ref, atol=3e-2, rtol=3e-2), "mismatch vs reference"

    print("KERNEL_OK")
</pallas_src>

<mosaic_0001>
module attributes {stable_mosaic.version = 11 : i64} {
  func.func @_kv_proj_kernel(%arg0: i32, %arg1: memref<8x128xf32, #tpu.memory_space<vmem>>, %arg2: memref<128x256xbf16, #tpu.memory_space<vmem>>, %arg3: memref<1x256xf32, #tpu.memory_space<vmem>>, %arg4: memref<8x256xbf16, #tpu.memory_space<vmem>>) attributes {dimension_semantics = [#tpu.dimension_semantics<parallel>], iteration_bounds = array<i64: 1>, scalar_prefetch = 0 : i64, scratch_operands = 0 : i64, tpu.core_type = #tpu.core_type<tc>, window_params = [{transform_indices = @transform_0, window_bounds = array<i64: 8, 128>}, {pipeline_mode = #tpu.pipeline_mode<synchronous>, transform_indices = @transform_1, window_bounds = array<i64: 128, 256>}, {pipeline_mode = #tpu.pipeline_mode<synchronous>, transform_indices = @transform_2, window_bounds = array<i64: 1, 256>}, {transform_indices = @transform_3, window_bounds = array<i64: 8, 256>}]} {
    %c0 = arith.constant 0 : index
    %c0_0 = arith.constant 0 : index
    %0 = vector.load %arg1[%c0, %c0_0] : memref<8x128xf32, #tpu.memory_space<vmem>>, vector<8x128xf32>
    %1 = arith.truncf %0 : vector<8x128xf32> to vector<8x128xbf16>
    %c0_1 = arith.constant 0 : index
    %c0_2 = arith.constant 0 : index
    %2 = vector.load %arg2[%c0_1, %c0_2] : memref<128x256xbf16, #tpu.memory_space<vmem>>, vector<128x256xbf16>
    %cst = arith.constant dense<0.000000e+00> : vector<8x256xf32>
    %3 = tpu.matmul %1, %2, %cst {dimension_numbers = #tpu.dot_dimension_numbers<[1], [0], [0], [1], [0, 0, 1, 1], [], []>} : vector<8x128xbf16>, vector<128x256xbf16>, vector<8x256xf32> -> vector<8x256xf32>
    %c0_3 = arith.constant 0 : index
    %c0_4 = arith.constant 0 : index
    %4 = vector.load %arg3[%c0_3, %c0_4] : memref<1x256xf32, #tpu.memory_space<vmem>>, vector<1x256xf32>
    %5 = vector.broadcast %4 : vector<1x256xf32> to vector<8x256xf32>
    %6 = arith.addf %3, %5 : vector<8x256xf32>
    %7 = arith.truncf %6 : vector<8x256xf32> to vector<8x256xbf16>
    %c0_5 = arith.constant 0 : index
    %c0_6 = arith.constant 0 : index
    %8 = vector.load %arg4[%c0_5, %c0_6] : memref<8x256xbf16, #tpu.memory_space<vmem>>, vector<8x256xbf16>
    tpu.vector_store %arg4[%c0_5, %c0_6], %7 {strides = array<i32>} : memref<8x256xbf16, #tpu.memory_space<vmem>>, vector<8x256xbf16>,
    return
  }
  func.func @transform_0(%arg0: i32) -> (i32, i32) {
    %c0_i32 = arith.constant 0 : i32
    %c0_i32_0 = arith.constant 0 : i32
    return %arg0, %c0_i32 : i32, i32
  }
  func.func @transform_1(%arg0: i32) -> (i32, i32) {
    %c0_i32 = arith.constant 0 : i32
    %c0_i32_0 = arith.constant 0 : i32
    %c0_i32_1 = arith.constant 0 : i32
    return %c0_i32, %c0_i32_0 : i32, i32
  }
  func.func @transform_2(%arg0: i32) -> (i32, i32) {
    %c0_i32 = arith.constant 0 : i32
    %c0_i32_0 = arith.constant 0 : i32
    %c0_i32_1 = arith.constant 0 : i32
    return %c0_i32, %c0_i32_0 : i32, i32
  }
  func.func @transform_3(%arg0: i32) -> (i32, i32) {
    %c0_i32 = arith.constant 0 : i32
    %c0_i32_0 = arith.constant 0 : i32
    return %arg0, %c0_i32 : i32, i32
  }
}

</mosaic_0001>

<bundles_post_ra>
// kernel: tpu_custom_call.1
= control target key start
LH: loop header
LB: loop body
LE: loop exit
PB: predicated region body
PF: predicated region fallthrough
CT: control target
= control target key end

     0   :  { %8 = vsyncpa [#allocation3], 0  ;;  %s410_s0 = inlined_call_operand.hbm [shape: f32[8,128], index: 0, kind: input, shape index: {}]   ;;  %s411_s1 = inlined_call_operand.hbm [shape: bf16[128,256], index: 1, kind: input, shape index: {}]   ;;  %s412_s2 = inlined_call_operand.vmem [shape: f32[1,256], index: 2, kind: input, shape index: {}]   ;;  %s413_s3 = inlined_call_operand.hbm [shape: bf16[8,256], index: 3, kind: output, shape index: {}]  }
   0x1   :  { %9 = vsyncpa [#allocation6], 0 }
   0x2   :  { %10 = vsyncpa [#allocation4], 0  ;;  %s338_s12 = smov [#allocation2]   ;;  %s339_s14 = smov [#allocation5]  }
   0x3   :  { %s17_s13 = sshll.u32 %s338_s12, 4  ;;  %s26_s15 = sshll.u32 %s339_s14, 4  ;;  %s18_s13 = int_to_ptr.vmem [resolvable:$true] %s17_s13  ;;  %s364_s15 = int_to_ptr.vmem [resolvable:$true] %s26_s15 }
   0x4   :  { %s266_s18 = scalar_lea.hbm %s410_s0, 128 }
   0x5   :  { %p267_p0 = scmp.ne.s32.totalorder %s410_s0, %s266_s18  ;;  %p270_p1 = scmp.lt.u32.totalorder %s266_s18, %s410_s0 }
   0x7   :  { %p272_p2 = pnand %p270_p1, %p267_p0 }
   0x9   :  { %275 = shalt.err (!%p272_p2)
}
   0xa   :  { %s276_s23 = scalar_lea.vmem %s18_s13, 128  ;;  %p281_p4 = scmp.lt.s32.totalorder %s18_s13, %s18_s13 }
   0xb   :  { %p277_p3 = scmp.ne.s32.totalorder %s18_s13, %s276_s23  ;;  %p282_p5 = scmp.lt.s32.totalorder %s276_s23, %s276_s23 }
   0xd   :  { %p283_p6 = por %p282_p5, %p281_p4 }
   0xf   :  { %p284_p7 = pnand %p283_p6, %p277_p3 }
  0x11   :  { %287 = shalt.err (!%p284_p7)
}
  0x12   :  { %20 = dma.hbm_to_vmem [thread:$0]  %s410_s0, 128, %s18_s13, [#allocation3]  }
  0x13   :  { %s288_s28 = scalar_lea.hbm %s411_s1, 2048 }
  0x14   :  { %p289_p8 = scmp.ne.s32.totalorder %s411_s1, %s288_s28  ;;  %p292_p9 = scmp.lt.u32.totalorder %s288_s28, %s411_s1 }
  0x16   :  { %p294_p10 = pnand %p292_p9, %p289_p8 }
  0x18   :  { %297 = shalt.err (!%p294_p10)
}
  0x19   :  { %s298_s6 = scalar_lea.vmem %s364_s15, 2048  ;;  %p303_p12 = scmp.lt.s32.totalorder %s364_s15, %s364_s15 }
  0x1a   :  { %p299_p11 = scmp.ne.s32.totalorder %s364_s15, %s298_s6  ;;  %p304_p13 = scmp.lt.s32.totalorder %s298_s6, %s298_s6 }
  0x1c   :  { %p305_p0 = por %p304_p13, %p303_p12 }
  0x1e   :  { %p306_p1 = pnand %p305_p0, %p299_p11 }
  0x20   :  { %309 = shalt.err (!%p306_p1)
}
  0x21   :  { %s340_s0 = smov 128   ;;  %s341_s7 = smov 8  }
  0x22   :  { %32 = dma.hbm_to_vmem [thread:$0]  %s411_s1, 2048, %s364_s15, [#allocation6], %s340_s0, %s340_s0, %s341_s7  }
  0x23   :  { %332 = dma.done.wait [#allocation3], 128  }
  0x24   :  { %333 = vsyncadd [#allocation3], 4294967168 }
  0x25   :  { %334 = dma.done.wait [#allocation6], 2048  }
  0x26   :  { %335 = vsyncadd [#allocation6], 4294965248  ;;  %v342_v0 = vmov 0   ;;  %v242_v1 = vld [vmem:[#allocation5 + $0x4] ss:$8 sps:$4 sm:$0xff]   ;;  %v42_v17 = vld [vmem:[#allocation2] sm:$0xff]  ;;  %v62_v19 = vlaneseq }
  0x27   :  { %184 = vmatprep.mubr.bf16.mxu0 %v342_v0  ;;  %v244_v2 = vld [vmem:[#allocation5] ss:$8 sps:$4 sm:$0xff]   ;;  %152 = vmatprep.subr.bf16.mxu0 %v242_v1  ;;  %v245_v3 = vld [vmem:[#allocation5 + $0x14] ss:$8 sps:$4 sm:$0xff]   ;;  %v247_v4 = vld [vmem:[#allocation5 + $0x10] ss:$8 sps:$4 sm:$0xff]   ;;  %v43_v18 = vpack.c.bf16 %v42_v17, %v42_v17 }
  0x28   :  { %153 = vmatpush1.bf16.msra.mxu0 %v244_v2  ;;  %v248_v5 = vld [vmem:[#allocation5 + $0x24] ss:$8 sps:$4 sm:$0xff]   ;;  %v250_v6 = vld [vmem:[#allocation5 + $0x20] ss:$8 sps:$4 sm:$0xff]   ;;  %v251_v7 = vld [vmem:[#allocation5 + $0x34] ss:$8 sps:$4 sm:$0xff]  }
  0x29   :  { %154 = vmatprep.subr.bf16.mxu0 %v245_v3  ;;  %v253_v8 = vld [vmem:[#allocation5 + $0x30] ss:$8 sps:$4 sm:$0xff]   ;;  %v254_v9 = vld [vmem:[#allocation5 + $0x44] ss:$8 sps:$4 sm:$0xff]   ;;  %v256_v10 = vld [vmem:[#allocation5 + $0x40] ss:$8 sps:$4 sm:$0xff]  }
  0x2a   :  { %v257_v11 = vld [vmem:[#allocation5 + $0x54] ss:$8 sps:$4 sm:$0xff]   ;;  %v259_v12 = vld [vmem:[#allocation5 + $0x50] ss:$8 sps:$4 sm:$0xff]   ;;  %v260_v13 = vld [vmem:[#allocation5 + $0x64] ss:$8 sps:$4 sm:$0xff]  }
  0x2b   :  { %v262_v14 = vld [vmem:[#allocation5 + $0x60] ss:$8 sps:$4 sm:$0xff]   ;;  %v263_v15 = vld [vmem:[#allocation5 + $0x74] ss:$8 sps:$4 sm:$0xff]   ;;  %v265_v16 = vld [vmem:[#allocation5 + $0x70] ss:$8 sps:$4 sm:$0xff]  }
  0x2c   :  { %155 = vmatpush1.bf16.msra.mxu0 %v247_v4  ;;  %v63_v20 = vshrl.u32 %v62_v19, 7  ;;  %v60_v22 = vld [vmem:[%s412_s2] sm:$0x3]  ;;  %s343_s11 = smov [#allocation7]  }
  0x2d   :  { %156 = vmatprep.subr.bf16.mxu0 %v248_v5  ;;  %s208_s12 = sshll.u32 %s343_s11, 4  ;;  %s209_s12 = int_to_ptr.vmem [resolvable:$true] %s208_s12 }
  0x2e   :  { %v64_v21 = vsub.s32 0, %v63_v20  ;;  %v68_v23 = vsub.s32 1, %v63_v20  ;;  %s310_s13 = scalar_lea.vmem %s209_s12, 128  ;;  %p315_p3 = scmp.lt.s32.totalorder %s209_s12, %s209_s12 }
  0x2f   :  { %p311_p2 = scmp.ne.s32.totalorder %s209_s12, %s310_s13  ;;  %p316_p4 = scmp.lt.s32.totalorder %s310_s13, %s310_s13 }
  0x30   :  { %157 = vmatpush1.bf16.msra.mxu0 %v250_v6  ;;  %v65_v24 = vrot.slane %v60_v22, %v64_v21  ;;  %v69_v25 = vrot.slane %v60_v22, %v68_v23 }
  0x31   :  { %158 = vmatprep.subr.bf16.mxu0 %v251_v7  ;;  %p317_p5 = por %p316_p4, %p315_p3 }
  0x33   :  { %p318_p6 = pnand %p317_p5, %p311_p2 }
  0x34   :  { %159 = vmatpush1.bf16.msra.mxu0 %v253_v8 }
  0x35   :  { %160 = vmatprep.subr.bf16.mxu0 %v254_v9 }
  0x38   :  { %161 = vmatpush1.bf16.msra.mxu0 %v256_v10 }
  0x39   :  { %162 = vmatprep.subr.bf16.mxu0 %v257_v11 }
  0x3c   :  { %163 = vmatpush1.bf16.msra.mxu0 %v259_v12 }
  0x3d   :  { %164 = vmatprep.subr.bf16.mxu0 %v260_v13 }
  0x40   :  { %165 = vmatpush1.bf16.msra.mxu0 %v262_v14 }
  0x41   :  { %166 = vmatprep.subr.bf16.mxu0 %v263_v15 }
  0x44   :  { %167 = vmatpush1.bf16.msra.mxu0 %v265_v16 }
  0x47   :  { %185 = vmatmul.mubr.bf16.vlgmr.msra.gmra.mrb[0].mxu0 %v43_v18 }
 0x11a   :  { %v186_v26 = vpop.f32.mrb[0].mxu0 }
 0x11b   :  { %v187_v27 = vadd.f32 %v186_v26, %v65_v24  ;;  %v188_v28 = vpop.f32.mrb[1].mxu0 }
 0x11c   :  { %v189_v29 = vadd.f32 %v188_v28, %v69_v25  ;;  %v190_v30 = vpop.f32.mrb[2].mxu0 }
 0x11d   :  { %v191_v31 = vpop.f32.mrb[3].mxu0 }
 0x11e   :  { %v235_v32 = vpack.c.bf16 %v189_v29, %v187_v27 }
 0x120   :  { %201 = vst [vmem:[#allocation7] sm:$0xff] %v235_v32 }
 0x121   :  { %321 = shalt.err (!%p318_p6)
}
 0x122   :  { %s322_s15 = scalar_lea.hbm %s413_s3, 128 }
 0x123   :  { %p323_p7 = scmp.ne.s32.totalorder %s413_s3, %s322_s15  ;;  %p326_p8 = scmp.lt.u32.totalorder %s322_s15, %s413_s3 }
 0x125   :  { %p328_p9 = pnand %p326_p8, %p323_p7 }
 0x127   :  { %331 = shalt.err (!%p328_p9)
}
 0x128   :  { %211 = dma.vmem_to_hbm [thread:$0]  %s209_s12, 128, %s413_s3, [#allocation4]  }
 0x129   :  { %336 = dma.done.wait [#allocation4], 128  }
 0x12a   :  { %337 = vsyncadd [#allocation4], 4294967168 }
 0x12b   :  { %215 = vsyncpa [#allocation3], 1 }
 0x12c   :  { %216 = vsyncpa [#allocation6], 1 }
 0x12d   :  { %217 = vsyncpa [#allocation4], 1 }

</bundles_post_ra>
